<compile_context>
chip_gen: v6e
topology: v6e:2x2x1
jax: 0.10.0
libtpu: 0.0.40
codegen_flags: <defaults>
</compile_context>

<pallas_src>
import functools

import jax
import jax.numpy as jnp
from jax import lax
from jax.experimental import pallas as pl
from jax.experimental.pallas import tpu as pltpu


def _cgd_chunk_kernel(a_ref, c_ref, yinit_ref,          # inputs
                      traj_ref, scal_ref,               # outputs
                      *, T, BC, N, Dy, eps, norm_type, max_norm):
    """Grid = (num_chunks,). One program runs ALL T descent steps for a chunk
    of BC batch samples (batch folded into the matmul M dimension).

    a_ref    : (Dy, Dy)          f32  A = W @ W^T      (hoisted to wrapper)
    c_ref    : (BC, N, Dy)       f32  C_b = x_b @ W^T  (hoisted to wrapper)
    yinit_ref: (1, N, Dy)        f32  shared y_init
    traj_ref : (T+1, BC, N, Dy)  f32  y_0 .. y_T for this chunk (one DMA back)
    scal_ref : (1, 1, T+1)       f32  [e_0 .. e_{T-1}, sum_t sum|g_clip|]
    """
    A = a_ref[...]                                      # (Dy, Dy)
    C3 = c_ref[...]                                     # (BC, N, Dy)
    # Merging/splitting the leading dims is layout-free when N % 8 == 0.
    C2 = C3.reshape(BC * N, Dy)

    y0 = jnp.broadcast_to(yinit_ref[0][None], (BC, N, Dy))
    traj_ref[0] = y0                                    # ys[0] = y_init (no wrapper concat)

    # Hoisted out of the loop (JAX does not CSE broadcast_in_dim).
    lane = lax.broadcasted_iota(jnp.int32, (1, 1, T + 1), 2)

    def step(t, carry):
        y2, gn, e_row = carry                           # y2: (BC*N, Dy), lives in vregs
        # One MXU matmul per step, batch folded into M.
        ya = jnp.dot(y2, A, preferred_element_type=jnp.float32)
        g = ya - C2                                     # dE/dy = (yW - x) W^T
        # E_chunk = 0.5 * sum(y * (yA - 2C)); the wrapper adds 0.5*||x||^2 (batch total).
        e_t = 0.5 * jnp.sum(y2 * (g - C2))

        # clip_gradient: branch chosen by norm_type; the norm itself is always
        # per-sample L2 over dims (1, 2) (matches torch grads.norm(2.0, dim=(1,2))).
        if norm_type is None:
            g_clip2 = g
        elif norm_type == 0.0:
            g_clip2 = jnp.clip(g, -max_norm, max_norm)
        else:
            g3 = g.reshape(BC, N, Dy)
            gsq = jnp.sum(jnp.sum(g3 * g3, axis=2, keepdims=True),   # lane reduce
                          axis=1, keepdims=True)                     # sublane reduce -> (BC,1,1)
            denom = jnp.sqrt(gsq) + 1e-6
            inv = pl.reciprocal(denom, approx=True)                  # EUP slot
            inv = inv * (2.0 - denom * inv)                          # 1 Newton step -> ~f32 exact
            coef = jnp.clip(max_norm * inv, 0.0, 1.0)
            g_clip2 = (g3 * coef).reshape(BC * N, Dy)

        y_new = y2 - eps * g_clip2
        traj_ref[t + 1] = y_new.reshape(BC, N, Dy)      # store into resident output block

        e_row = jnp.where(lane == t, e_t, e_row)        # single-vreg select, no VMEM RMW
        gn = gn + jnp.sum(jnp.abs(g_clip2))
        return y_new, gn, e_row

    init = (y0.reshape(BC * N, Dy),
            jnp.float32(0.0),
            jnp.zeros((1, 1, T + 1), jnp.float32))
    # Short static trip count -> fully unroll (LLO scheduler visibility).
    _, gn, e_row = lax.fori_loop(0, T, step, init, unroll=True)

    # Single write of all per-step scalars (energies + L1 grad-norm sum).
    scal_ref[...] = jnp.where(lane == T, gn, e_row)


def clipped_gradient_descent(x, w, y_init, *, T, eps, norm_type, max_norm,
                             num_chunks=None):
    """Wrapper: hoists loop-invariant algebra to XLA, launches the chunked kernel."""
    x = x.astype(jnp.float32)
    w = w.astype(jnp.float32)
    y_init = y_init.astype(jnp.float32)
    B, N, Dx = x.shape
    Dy = y_init.shape[-1]

    if num_chunks is None:
        # Even, >=2 chunks keep both v7x TensorCores busy; on single-TC v5e/v6e
        # num_chunks=1 folds the whole batch into one matmul instead.
        num_chunks = 2 if (B >= 2 and B % 2 == 0) else 1
    assert B % num_chunks == 0, "batch must divide num_chunks"
    BC = B // num_chunks

    # Batch-/loop-invariant precompute hoisted to XLA (fills the MXU far better
    # than per-sample (N,Dx) matmuls and removes w/x DMAs from the kernel).
    hp = lax.Precision.HIGHEST
    a = jnp.dot(w, w.T, precision=hp)                        # (Dy, Dy)
    c = jnp.einsum('bnx,yx->bny', x, w, precision=hp)        # (B, N, Dy)
    xsq_half = 0.5 * jnp.sum(x * x)                          # added to energies below

    kernel = functools.partial(_cgd_chunk_kernel, T=T, BC=BC, N=N, Dy=Dy,
                               eps=eps, norm_type=norm_type, max_norm=max_norm)

    traj, scal = pl.pallas_call(
        kernel,
        grid=(num_chunks,),
        out_shape=(
            jax.ShapeDtypeStruct((T + 1, B, N, Dy), jnp.float32),   # y_0 .. y_T
            jax.ShapeDtypeStruct((num_chunks, 1, T + 1), jnp.float32),
        ),
        in_specs=[
            pl.BlockSpec((Dy, Dy), lambda g: (0, 0)),               # A
            pl.BlockSpec((BC, N, Dy), lambda g: (g, 0, 0)),         # C chunk
            pl.BlockSpec((1, N, Dy), lambda g: (0, 0, 0)),          # y_init
        ],
        out_specs=(
            pl.BlockSpec((T + 1, BC, N, Dy), lambda g: (0, g, 0, 0)),  # one DMA per chunk
            pl.BlockSpec((1, 1, T + 1), lambda g: (g, 0, 0)),
        ),
        compiler_params=pltpu.CompilerParams(
            dimension_semantics=("parallel",)),
    )(a, c, y_init)

    energies = jnp.sum(scal[:, 0, :T], axis=0) + xsq_half    # (T,) == energy.sum(batch)
    gradnorm = jnp.reshape(jnp.sum(scal[:, 0, T]) / T, (1,)) # (1,)
    return list(traj), dict(energies=energies, gradnorm=gradnorm)


def _reference(x, w, y_init, *, T, eps, norm_type, max_norm):
    """Pure-JAX reference mirroring the PyTorch forward semantics (direct form)."""
    hp = lax.Precision.HIGHEST
    B, N, Dx = x.shape
    Dy = y_init.shape[-1]
    y = jnp.broadcast_to(y_init, (B, N, Dy)).astype(jnp.float32)
    ys, energies = [y], []
    gn = 0.0
    for _ in range(T):
        r = jnp.einsum('bnd,de->bne', y, w, precision=hp) - x
        e = 0.5 * jnp.sum(r * r)
        g = jnp.einsum('bne,de->bnd', r, w, precision=hp)
        if norm_type is None:
            pass
        elif norm_type == 0.0:
            g = jnp.clip(g, -max_norm, max_norm)
        else:
            gnorm = jnp.sqrt(jnp.sum(g * g, axis=(1, 2), keepdims=True))
            g = g * jnp.clip(max_norm / (gnorm + 1e-6), 0.0, 1.0)
        y = y - eps * g
        ys.append(y)
        energies.append(e)
        gn = gn + jnp.sum(jnp.abs(g))
    return jnp.stack(ys), jnp.stack(energies), jnp.reshape(gn / T, (1,))


if __name__ == "__main__":
    # Module hyper-parameters (small, consistent with the forward).
    B, N, Dy, Dx = 2, 8, 32, 16
    T, eps, norm_type, max_norm = 4, 0.1, 2.0, 1.0

    key = jax.random.PRNGKey(0)
    kx, kw, ky = jax.random.split(key, 3)
    x = jax.random.normal(kx, (B, N, Dx), dtype=jnp.float32)
    w = 0.1 * jax.random.normal(kw, (Dy, Dx), dtype=jnp.float32)   # energy param
    # nn.init.uniform_(self.y_init)  -> U[0, 1), shape (1, n_points, d_y)
    y_init = jax.random.uniform(ky, (1, N, Dy), dtype=jnp.float32)

    ys, aux = clipped_gradient_descent(
        x, w, y_init, T=T, eps=eps, norm_type=norm_type, max_norm=max_norm)
    ys_arr = jax.block_until_ready(jnp.stack(ys))
    energies = jax.block_until_ready(aux["energies"])
    gradnorm = jax.block_until_ready(aux["gradnorm"])

    ys_exp, e_exp, gn_exp = _reference(
        x, w, y_init, T=T, eps=eps, norm_type=norm_type, max_norm=max_norm)

    assert jnp.allclose(ys_arr, ys_exp, atol=2e-4, rtol=2e-4), \
        float(jnp.max(jnp.abs(ys_arr - ys_exp)))
    assert jnp.allclose(energies, e_exp, atol=5e-3, rtol=5e-4), \
        float(jnp.max(jnp.abs(energies - e_exp)))
    assert jnp.allclose(gradnorm, gn_exp, atol=5e-3, rtol=5e-4), \
        float(jnp.max(jnp.abs(gradnorm - gn_exp)))

    print("KERNEL_OK")
</pallas_src>

<mosaic_0001>
module attributes {stable_mosaic.version = 11 : i64} {
  func.func @_cgd_chunk_kernel(%arg0: i32, %arg1: memref<32x32xf32, #tpu.memory_space<vmem>>, %arg2: memref<1x8x32xf32, #tpu.memory_space<vmem>>, %arg3: memref<1x8x32xf32, #tpu.memory_space<vmem>>, %arg4: memref<5x1x8x32xf32, #tpu.memory_space<vmem>>, %arg5: memref<1x1x5xf32, #tpu.memory_space<vmem>>) attributes {dimension_semantics = [#tpu.dimension_semantics<parallel>], iteration_bounds = array<i64: 2>, scalar_prefetch = 0 : i64, scratch_operands = 0 : i64, tpu.core_type = #tpu.core_type<tc>, window_params = [{pipeline_mode = #tpu.pipeline_mode<synchronous>, transform_indices = @transform_0, window_bounds = array<i64: 32, 32>}, {transform_indices = @transform_1, window_bounds = array<i64: 1, 8, 32>}, {pipeline_mode = #tpu.pipeline_mode<synchronous>, transform_indices = @transform_2, window_bounds = array<i64: 1, 8, 32>}, {transform_indices = @transform_3, window_bounds = array<i64: 5, 1, 8, 32>}, {transform_indices = @transform_4, window_bounds = array<i64: 1, 1, 5>}]} {
    %c0 = arith.constant 0 : index
    %c0_0 = arith.constant 0 : index
    %0 = vector.load %arg1[%c0, %c0_0] : memref<32x32xf32, #tpu.memory_space<vmem>>, vector<32x32xf32>
    %c0_1 = arith.constant 0 : index
    %c0_2 = arith.constant 0 : index
    %c0_3 = arith.constant 0 : index
    %1 = vector.load %arg2[%c0_1, %c0_2, %c0_3] : memref<1x8x32xf32, #tpu.memory_space<vmem>>, vector<1x8x32xf32>
    %2 = vector.shape_cast %1 : vector<1x8x32xf32> to vector<8x32xf32>
    %c0_4 = arith.constant 0 : index
    %c0_5 = arith.constant 0 : index
    %c0_6 = arith.constant 0 : index
    %3 = vector.load %arg3[%c0_4, %c0_5, %c0_6] : memref<1x8x32xf32, #tpu.memory_space<vmem>>, vector<1x8x32xf32>
    %4 = vector.shape_cast %3 : vector<1x8x32xf32> to vector<8x32xf32>
    %5 = vector.shape_cast %4 : vector<8x32xf32> to vector<1x8x32xf32>
    %c0_7 = arith.constant 0 : index
    %c0_8 = arith.constant 0 : index
    %c0_9 = arith.constant 0 : index
    %c0_10 = arith.constant 0 : index
    %6 = vector.load %arg4[%c0_7, %c0_8, %c0_9, %c0_10] : memref<5x1x8x32xf32, #tpu.memory_space<vmem>>, vector<1x1x8x32xf32>
    %7 = vector.shape_cast %6 : vector<1x1x8x32xf32> to vector<1x8x32xf32>
    %8 = vector.shape_cast %5 : vector<1x8x32xf32> to vector<1x1x8x32xf32>
    tpu.vector_store %arg4[%c0_7, %c0_8, %c0_9, %c0_10], %8 {strides = array<i32>} : memref<5x1x8x32xf32, #tpu.memory_space<vmem>>, vector<1x1x8x32xf32>,
    %9 = tpu.iota {dimensions = array<i32: 2>} : vector<1x1x5xi32>
    %10 = vector.shape_cast %5 : vector<1x8x32xf32> to vector<8x32xf32>
    %cst = arith.constant 0.000000e+00 : f32
    %11 = vector.broadcast %cst : f32 to vector<1x1x5xf32>
    %cst_11 = arith.constant 0.000000e+00 : f32
    %c0_i32 = arith.constant 0 : i32
    %cst_12 = arith.constant dense<0.000000e+00> : vector<8x32xf32>
    %12 = tpu.matmul %10, %0, %cst_12 {dimension_numbers = #tpu.dot_dimension_numbers<[1], [0], [0], [1], [0, 0, 1, 1], [], []>} : vector<8x32xf32>, vector<32x32xf32>, vector<8x32xf32> -> vector<8x32xf32>
    %13 = arith.subf %12, %2 : vector<8x32xf32>
    %14 = arith.subf %13, %2 : vector<8x32xf32>
    %15 = arith.mulf %10, %14 : vector<8x32xf32>
    %16 = vector.shape_cast %15 : vector<8x32xf32> to vector<1x8x32xf32>
    %cst_13 = arith.constant dense<0.000000e+00> : vector<1xf32>
    %17 = vector.multi_reduction <add>, %16, %cst_13 [1, 2] : vector<1x8x32xf32> to vector<1xf32>
    %18 = vector.shape_cast %17 : vector<1xf32> to vector<1x1x1xf32>
    %19 = vector.extract %18[0, 0, 0] : f32 from vector<1x1x1xf32>
    %cst_14 = arith.constant 5.000000e-01 : f32
    %20 = arith.mulf %cst_14, %19 : f32
    %21 = vector.shape_cast %13 : vector<8x32xf32> to vector<1x8x32xf32>
    %22 = arith.mulf %21, %21 : vector<1x8x32xf32>
    %cst_15 = arith.constant dense<0.000000e+00> : vector<1x8xf32>
    %23 = vector.multi_reduction <add>, %22, %cst_15 [2] : vector<1x8x32xf32> to vector<1x8xf32>
    %24 = vector.shape_cast %23 : vector<1x8xf32> to vector<1x8x1xf32>
    %cst_16 = arith.constant dense<0.000000e+00> : vector<1x1xf32>
    %25 = vector.multi_reduction <add>, %24, %cst_16 [1] : vector<1x8x1xf32> to vector<1x1xf32>
    %26 = vector.shape_cast %25 : vector<1x1xf32> to vector<1x1x1xf32>
    %27 = math.sqrt %26 : vector<1x1x1xf32>
    %cst_17 = arith.constant 9.99999997E-7 : f32
    %28 = vector.broadcast %cst_17 : f32 to vector<1x1x1xf32>
    %29 = arith.addf %27, %28 : vector<1x1x1xf32>
    %30 = tpu.reciprocal %29 {approx = true} : vector<1x1x1xf32> -> vector<1x1x1xf32>
    %31 = arith.mulf %29, %30 : vector<1x1x1xf32>
    %cst_18 = arith.constant 2.000000e+00 : f32
    %32 = vector.broadcast %cst_18 : f32 to vector<1x1x1xf32>
    %33 = arith.subf %32, %31 : vector<1x1x1xf32>
    %34 = arith.mulf %30, %33 : vector<1x1x1xf32>
    %cst_19 = arith.constant 1.000000e+00 : f32
    %35 = vector.broadcast %cst_19 : f32 to vector<1x1x1xf32>
    %36 = arith.mulf %35, %34 : vector<1x1x1xf32>
    %cst_20 = arith.constant 0.000000e+00 : f32
    %cst_21 = arith.constant 1.000000e+00 : f32
    %37 = vector.broadcast %cst_20 : f32 to vector<1x1x1xf32>
    %38 = arith.maximumf %37, %36 : vector<1x1x1xf32>
    %39 = vector.broadcast %cst_21 : f32 to vector<1x1x1xf32>
    %40 = arith.minimumf %39, %38 : vector<1x1x1xf32>
    %41 = vector.broadcast %40 : vector<1x1x1xf32> to vector<1x8x32xf32>
    %42 = arith.mulf %21, %41 : vector<1x8x32xf32>
    %43 = vector.shape_cast %42 : vector<1x8x32xf32> to vector<8x32xf32>
    %cst_22 = arith.constant 1.000000e-01 : f32
    %44 = vector.broadcast %cst_22 : f32 to vector<8x32xf32>
    %45 = arith.mulf %44, %43 : vector<8x32xf32>
    %46 = arith.subf %10, %45 : vector<8x32xf32>
    %47 = vector.shape_cast %46 : vector<8x32xf32> to vector<1x8x32xf32>
    %c1_i32 = arith.constant 1 : i32
    %48 = arith.addi %c0_i32, %c1_i32 : i32
    %49 = arith.index_cast %48 : i32 to index
    %c0_23 = arith.constant 0 : index
    %c0_24 = arith.constant 0 : index
    %c0_25 = arith.constant 0 : index
    %50 = vector.load %arg4[%49, %c0_23, %c0_24, %c0_25] : memref<5x1x8x32xf32, #tpu.memory_space<vmem>>, vector<1x1x8x32xf32>
    %51 = vector.shape_cast %50 : vector<1x1x8x32xf32> to vector<1x8x32xf32>
    %52 = vector.shape_cast %47 : vector<1x8x32xf32> to vector<1x1x8x32xf32>
    tpu.vector_store %arg4[%49, %c0_23, %c0_24, %c0_25], %52 {strides = array<i32>} : memref<5x1x8x32xf32, #tpu.memory_space<vmem>>, vector<1x1x8x32xf32>,
    %53 = vector.broadcast %c0_i32 : i32 to vector<1x1x5xi32>
    %54 = arith.cmpi eq, %9, %53 : vector<1x1x5xi32>
    %55 = vector.broadcast %20 : f32 to vector<1x1x5xf32>
    %56 = arith.select %54, %55, %11 : vector<1x1x5xi1>, vector<1x1x5xf32>
    %57 = math.absf %43 : vector<8x32xf32>
    %58 = vector.shape_cast %57 : vector<8x32xf32> to vector<1x8x32xf32>
    %cst_26 = arith.constant dense<0.000000e+00> : vector<1xf32>
    %59 = vector.multi_reduction <add>, %58, %cst_26 [1, 2] : vector<1x8x32xf32> to vector<1xf32>
    %60 = vector.shape_cast %59 : vector<1xf32> to vector<1x1x1xf32>
    %61 = vector.extract %60[0, 0, 0] : f32 from vector<1x1x1xf32>
    %62 = arith.addf %cst_11, %61 : f32
    %c1_i32_27 = arith.constant 1 : i32
    %cst_28 = arith.constant dense<0.000000e+00> : vector<8x32xf32>
    %63 = tpu.matmul %46, %0, %cst_28 {dimension_numbers = #tpu.dot_dimension_numbers<[1], [0], [0], [1], [0, 0, 1, 1], [], []>} : vector<8x32xf32>, vector<32x32xf32>, vector<8x32xf32> -> vector<8x32xf32>
    %64 = arith.subf %63, %2 : vector<8x32xf32>
    %65 = arith.subf %64, %2 : vector<8x32xf32>
    %66 = arith.mulf %46, %65 : vector<8x32xf32>
    %67 = vector.shape_cast %66 : vector<8x32xf32> to vector<1x8x32xf32>
    %cst_29 = arith.constant dense<0.000000e+00> : vector<1xf32>
    %68 = vector.multi_reduction <add>, %67, %cst_29 [1, 2] : vector<1x8x32xf32> to vector<1xf32>
    %69 = vector.shape_cast %68 : vector<1xf32> to vector<1x1x1xf32>
    %70 = vector.extract %69[0, 0, 0] : f32 from vector<1x1x1xf32>
    %cst_30 = arith.constant 5.000000e-01 : f32
    %71 = arith.mulf %cst_30, %70 : f32
    %72 = vector.shape_cast %64 : vector<8x32xf32> to vector<1x8x32xf32>
    %73 = arith.mulf %72, %72 : vector<1x8x32xf32>
    %cst_31 = arith.constant dense<0.000000e+00> : vector<1x8xf32>
    %74 = vector.multi_reduction <add>, %73, %cst_31 [2] : vector<1x8x32xf32> to vector<1x8xf32>
    %75 = vector.shape_cast %74 : vector<1x8xf32> to vector<1x8x1xf32>
    %cst_32 = arith.constant dense<0.000000e+00> : vector<1x1xf32>
    %76 = vector.multi_reduction <add>, %75, %cst_32 [1] : vector<1x8x1xf32> to vector<1x1xf32>
    %77 = vector.shape_cast %76 : vector<1x1xf32> to vector<1x1x1xf32>
    %78 = math.sqrt %77 : vector<1x1x1xf32>
    %cst_33 = arith.constant 9.99999997E-7 : f32
    %79 = vector.broadcast %cst_33 : f32 to vector<1x1x1xf32>
    %80 = arith.addf %78, %79 : vector<1x1x1xf32>
    %81 = tpu.reciprocal %80 {approx = true} : vector<1x1x1xf32> -> vector<1x1x1xf32>
    %82 = arith.mulf %80, %81 : vector<1x1x1xf32>
    %cst_34 = arith.constant 2.000000e+00 : f32
    %83 = vector.broadcast %cst_34 : f32 to vector<1x1x1xf32>
    %84 = arith.subf %83, %82 : vector<1x1x1xf32>
    %85 = arith.mulf %81, %84 : vector<1x1x1xf32>
    %cst_35 = arith.constant 1.000000e+00 : f32
    %86 = vector.broadcast %cst_35 : f32 to vector<1x1x1xf32>
    %87 = arith.mulf %86, %85 : vector<1x1x1xf32>
    %cst_36 = arith.constant 0.000000e+00 : f32
    %cst_37 = arith.constant 1.000000e+00 : f32
    %88 = vector.broadcast %cst_36 : f32 to vector<1x1x1xf32>
    %89 = arith.maximumf %88, %87 : vector<1x1x1xf32>
    %90 = vector.broadcast %cst_37 : f32 to vector<1x1x1xf32>
    %91 = arith.minimumf %90, %89 : vector<1x1x1xf32>
    %92 = vector.broadcast %91 : vector<1x1x1xf32> to vector<1x8x32xf32>
    %93 = arith.mulf %72, %92 : vector<1x8x32xf32>
    %94 = vector.shape_cast %93 : vector<1x8x32xf32> to vector<8x32xf32>
    %cst_38 = arith.constant 1.000000e-01 : f32
    %95 = vector.broadcast %cst_38 : f32 to vector<8x32xf32>
    %96 = arith.mulf %95, %94 : vector<8x32xf32>
    %97 = arith.subf %46, %96 : vector<8x32xf32>
    %98 = vector.shape_cast %97 : vector<8x32xf32> to vector<1x8x32xf32>
    %c1_i32_39 = arith.constant 1 : i32
    %99 = arith.addi %c1_i32_27, %c1_i32_39 : i32
    %100 = arith.index_cast %99 : i32 to index
    %c0_40 = arith.constant 0 : index
    %c0_41 = arith.constant 0 : index
    %c0_42 = arith.constant 0 : index
    %101 = vector.load %arg4[%100, %c0_40, %c0_41, %c0_42] : memref<5x1x8x32xf32, #tpu.memory_space<vmem>>, vector<1x1x8x32xf32>
    %102 = vector.shape_cast %101 : vector<1x1x8x32xf32> to vector<1x8x32xf32>
    %103 = vector.shape_cast %98 : vector<1x8x32xf32> to vector<1x1x8x32xf32>
    tpu.vector_store %arg4[%100, %c0_40, %c0_41, %c0_42], %103 {strides = array<i32>} : memref<5x1x8x32xf32, #tpu.memory_space<vmem>>, vector<1x1x8x32xf32>,
    %104 = vector.broadcast %c1_i32_27 : i32 to vector<1x1x5xi32>
    %105 = arith.cmpi eq, %9, %104 : vector<1x1x5xi32>
    %106 = vector.broadcast %71 : f32 to vector<1x1x5xf32>
    %107 = arith.select %105, %106, %56 : vector<1x1x5xi1>, vector<1x1x5xf32>
    %108 = math.absf %94 : vector<8x32xf32>
    %109 = vector.shape_cast %108 : vector<8x32xf32> to vector<1x8x32xf32>
    %cst_43 = arith.constant dense<0.000000e+00> : vector<1xf32>
    %110 = vector.multi_reduction <add>, %109, %cst_43 [1, 2] : vector<1x8x32xf32> to vector<1xf32>
    %111 = vector.shape_cast %110 : vector<1xf32> to vector<1x1x1xf32>
    %112 = vector.extract %111[0, 0, 0] : f32 from vector<1x1x1xf32>
    %113 = arith.addf %62, %112 : f32
    %c2_i32 = arith.constant 2 : i32
    %cst_44 = arith.constant dense<0.000000e+00> : vector<8x32xf32>
    %114 = tpu.matmul %97, %0, %cst_44 {dimension_numbers = #tpu.dot_dimension_numbers<[1], [0], [0], [1], [0, 0, 1, 1], [], []>} : vector<8x32xf32>, vector<32x32xf32>, vector<8x32xf32> -> vector<8x32xf32>
    %115 = arith.subf %114, %2 : vector<8x32xf32>
    %116 = arith.subf %115, %2 : vector<8x32xf32>
    %117 = arith.mulf %97, %116 : vector<8x32xf32>
    %118 = vector.shape_cast %117 : vector<8x32xf32> to vector<1x8x32xf32>
    %cst_45 = arith.constant dense<0.000000e+00> : vector<1xf32>
    %119 = vector.multi_reduction <add>, %118, %cst_45 [1, 2] : vector<1x8x32xf32> to vector<1xf32>
    %120 = vector.shape_cast %119 : vector<1xf32> to vector<1x1x1xf32>
    %121 = vector.extract %120[0, 0, 0] : f32 from vector<1x1x1xf32>
    %cst_46 = arith.constant 5.000000e-01 : f32
    %122 = arith.mulf %cst_46, %121 : f32
    %123 = vector.shape_cast %115 : vector<8x32xf32> to vector<1x8x32xf32>
    %124 = arith.mulf %123, %123 : vector<1x8x32xf32>
    %cst_47 = arith.constant dense<0.000000e+00> : vector<1x8xf32>
    %125 = vector.multi_reduction <add>, %124, %cst_47 [2] : vector<1x8x32xf32> to vector<1x8xf32>
    %126 = vector.shape_cast %125 : vector<1x8xf32> to vector<1x8x1xf32>
    %cst_48 = arith.constant dense<0.000000e+00> : vector<1x1xf32>
    %127 = vector.multi_reduction <add>, %126, %cst_48 [1] : vector<1x8x1xf32> to vector<1x1xf32>
    %128 = vector.shape_cast %127 : vector<1x1xf32> to vector<1x1x1xf32>
    %129 = math.sqrt %128 : vector<1x1x1xf32>
    %cst_49 = arith.constant 9.99999997E-7 : f32
    %130 = vector.broadcast %cst_49 : f32 to vector<1x1x1xf32>
    %131 = arith.addf %129, %130 : vector<1x1x1xf32>
    %132 = tpu.reciprocal %131 {approx = true} : vector<1x1x1xf32> -> vector<1x1x1xf32>
    %133 = arith.mulf %131, %132 : vector<1x1x1xf32>
    %cst_50 = arith.constant 2.000000e+00 : f32
    %134 = vector.broadcast %cst_50 : f32 to vector<1x1x1xf32>
    %135 = arith.subf %134, %133 : vector<1x1x1xf32>
    %136 = arith.mulf %132, %135 : vector<1x1x1xf32>
    %cst_51 = arith.constant 1.000000e+00 : f32
    %137 = vector.broadcast %cst_51 : f32 to vector<1x1x1xf32>
    %138 = arith.mulf %137, %136 : vector<1x1x1xf32>
    %cst_52 = arith.constant 0.000000e+00 : f32
    %cst_53 = arith.constant 1.000000e+00 : f32
    %139 = vector.broadcast %cst_52 : f32 to vector<1x1x1xf32>
    %140 = arith.maximumf %139, %138 : vector<1x1x1xf32>
    %141 = vector.broadcast %cst_53 : f32 to vector<1x1x1xf32>
    %142 = arith.minimumf %141, %140 : vector<1x1x1xf32>
    %143 = vector.broadcast %142 : vector<1x1x1xf32> to vector<1x8x32xf32>
    %144 = arith.mulf %123, %143 : vector<1x8x32xf32>
    %145 = vector.shape_cast %144 : vector<1x8x32xf32> to vector<8x32xf32>
    %cst_54 = arith.constant 1.000000e-01 : f32
    %146 = vector.broadcast %cst_54 : f32 to vector<8x32xf32>
    %147 = arith.mulf %146, %145 : vector<8x32xf32>
    %148 = arith.subf %97, %147 : vector<8x32xf32>
    %149 = vector.shape_cast %148 : vector<8x32xf32> to vector<1x8x32xf32>
    %c1_i32_55 = arith.constant 1 : i32
    %150 = arith.addi %c2_i32, %c1_i32_55 : i32
    %151 = arith.index_cast %150 : i32 to index
    %c0_56 = arith.constant 0 : index
    %c0_57 = arith.constant 0 : index
    %c0_58 = arith.constant 0 : index
    %152 = vector.load %arg4[%151, %c0_56, %c0_57, %c0_58] : memref<5x1x8x32xf32, #tpu.memory_space<vmem>>, vector<1x1x8x32xf32>
    %153 = vector.shape_cast %152 : vector<1x1x8x32xf32> to vector<1x8x32xf32>
    %154 = vector.shape_cast %149 : vector<1x8x32xf32> to vector<1x1x8x32xf32>
    tpu.vector_store %arg4[%151, %c0_56, %c0_57, %c0_58], %154 {strides = array<i32>} : memref<5x1x8x32xf32, #tpu.memory_space<vmem>>, vector<1x1x8x32xf32>,
    %155 = vector.broadcast %c2_i32 : i32 to vector<1x1x5xi32>
    %156 = arith.cmpi eq, %9, %155 : vector<1x1x5xi32>
    %157 = vector.broadcast %122 : f32 to vector<1x1x5xf32>
    %158 = arith.select %156, %157, %107 : vector<1x1x5xi1>, vector<1x1x5xf32>
    %159 = math.absf %145 : vector<8x32xf32>
    %160 = vector.shape_cast %159 : vector<8x32xf32> to vector<1x8x32xf32>
    %cst_59 = arith.constant dense<0.000000e+00> : vector<1xf32>
    %161 = vector.multi_reduction <add>, %160, %cst_59 [1, 2] : vector<1x8x32xf32> to vector<1xf32>
    %162 = vector.shape_cast %161 : vector<1xf32> to vector<1x1x1xf32>
    %163 = vector.extract %162[0, 0, 0] : f32 from vector<1x1x1xf32>
    %164 = arith.addf %113, %163 : f32
    %c3_i32 = arith.constant 3 : i32
    %cst_60 = arith.constant dense<0.000000e+00> : vector<8x32xf32>
    %165 = tpu.matmul %148, %0, %cst_60 {dimension_numbers = #tpu.dot_dimension_numbers<[1], [0], [0], [1], [0, 0, 1, 1], [], []>} : vector<8x32xf32>, vector<32x32xf32>, vector<8x32xf32> -> vector<8x32xf32>
    %166 = arith.subf %165, %2 : vector<8x32xf32>
    %167 = arith.subf %166, %2 : vector<8x32xf32>
    %168 = arith.mulf %148, %167 : vector<8x32xf32>
    %169 = vector.shape_cast %168 : vector<8x32xf32> to vector<1x8x32xf32>
    %cst_61 = arith.constant dense<0.000000e+00> : vector<1xf32>
    %170 = vector.multi_reduction <add>, %169, %cst_61 [1, 2] : vector<1x8x32xf32> to vector<1xf32>
    %171 = vector.shape_cast %170 : vector<1xf32> to vector<1x1x1xf32>
    %172 = vector.extract %171[0, 0, 0] : f32 from vector<1x1x1xf32>
    %cst_62 = arith.constant 5.000000e-01 : f32
    %173 = arith.mulf %cst_62, %172 : f32
    %174 = vector.shape_cast %166 : vector<8x32xf32> to vector<1x8x32xf32>
    %175 = arith.mulf %174, %174 : vector<1x8x32xf32>
    %cst_63 = arith.constant dense<0.000000e+00> : vector<1x8xf32>
    %176 = vector.multi_reduction <add>, %175, %cst_63 [2] : vector<1x8x32xf32> to vector<1x8xf32>
    %177 = vector.shape_cast %176 : vector<1x8xf32> to vector<1x8x1xf32>
    %cst_64 = arith.constant dense<0.000000e+00> : vector<1x1xf32>
    %178 = vector.multi_reduction <add>, %177, %cst_64 [1] : vector<1x8x1xf32> to vector<1x1xf32>
    %179 = vector.shape_cast %178 : vector<1x1xf32> to vector<1x1x1xf32>
    %180 = math.sqrt %179 : vector<1x1x1xf32>
    %cst_65 = arith.constant 9.99999997E-7 : f32
    %181 = vector.broadcast %cst_65 : f32 to vector<1x1x1xf32>
    %182 = arith.addf %180, %181 : vector<1x1x1xf32>
    %183 = tpu.reciprocal %182 {approx = true} : vector<1x1x1xf32> -> vector<1x1x1xf32>
    %184 = arith.mulf %182, %183 : vector<1x1x1xf32>
    %cst_66 = arith.constant 2.000000e+00 : f32
    %185 = vector.broadcast %cst_66 : f32 to vector<1x1x1xf32>
    %186 = arith.subf %185, %184 : vector<1x1x1xf32>
    %187 = arith.mulf %183, %186 : vector<1x1x1xf32>
    %cst_67 = arith.constant 1.000000e+00 : f32
    %188 = vector.broadcast %cst_67 : f32 to vector<1x1x1xf32>
    %189 = arith.mulf %188, %187 : vector<1x1x1xf32>
    %cst_68 = arith.constant 0.000000e+00 : f32
    %cst_69 = arith.constant 1.000000e+00 : f32
    %190 = vector.broadcast %cst_68 : f32 to vector<1x1x1xf32>
    %191 = arith.maximumf %190, %189 : vector<1x1x1xf32>
    %192 = vector.broadcast %cst_69 : f32 to vector<1x1x1xf32>
    %193 = arith.minimumf %192, %191 : vector<1x1x1xf32>
    %194 = vector.broadcast %193 : vector<1x1x1xf32> to vector<1x8x32xf32>
    %195 = arith.mulf %174, %194 : vector<1x8x32xf32>
    %196 = vector.shape_cast %195 : vector<1x8x32xf32> to vector<8x32xf32>
    %cst_70 = arith.constant 1.000000e-01 : f32
    %197 = vector.broadcast %cst_70 : f32 to vector<8x32xf32>
    %198 = arith.mulf %197, %196 : vector<8x32xf32>
    %199 = arith.subf %148, %198 : vector<8x32xf32>
    %200 = vector.shape_cast %199 : vector<8x32xf32> to vector<1x8x32xf32>
    %c1_i32_71 = arith.constant 1 : i32
    %201 = arith.addi %c3_i32, %c1_i32_71 : i32
    %202 = arith.index_cast %201 : i32 to index
    %c0_72 = arith.constant 0 : index
    %c0_73 = arith.constant 0 : index
    %c0_74 = arith.constant 0 : index
    %203 = vector.load %arg4[%202, %c0_72, %c0_73, %c0_74] : memref<5x1x8x32xf32, #tpu.memory_space<vmem>>, vector<1x1x8x32xf32>
    %204 = vector.shape_cast %203 : vector<1x1x8x32xf32> to vector<1x8x32xf32>
    %205 = vector.shape_cast %200 : vector<1x8x32xf32> to vector<1x1x8x32xf32>
    tpu.vector_store %arg4[%202, %c0_72, %c0_73, %c0_74], %205 {strides = array<i32>} : memref<5x1x8x32xf32, #tpu.memory_space<vmem>>, vector<1x1x8x32xf32>,
    %206 = vector.broadcast %c3_i32 : i32 to vector<1x1x5xi32>
    %207 = arith.cmpi eq, %9, %206 : vector<1x1x5xi32>
    %208 = vector.broadcast %173 : f32 to vector<1x1x5xf32>
    %209 = arith.select %207, %208, %158 : vector<1x1x5xi1>, vector<1x1x5xf32>
    %210 = math.absf %196 : vector<8x32xf32>
    %211 = vector.shape_cast %210 : vector<8x32xf32> to vector<1x8x32xf32>
    %cst_75 = arith.constant dense<0.000000e+00> : vector<1xf32>
    %212 = vector.multi_reduction <add>, %211, %cst_75 [1, 2] : vector<1x8x32xf32> to vector<1xf32>
    %213 = vector.shape_cast %212 : vector<1xf32> to vector<1x1x1xf32>
    %214 = vector.extract %213[0, 0, 0] : f32 from vector<1x1x1xf32>
    %215 = arith.addf %164, %214 : f32
    %c4_i32 = arith.constant 4 : i32
    %c4_i32_76 = arith.constant 4 : i32
    %216 = vector.broadcast %c4_i32_76 : i32 to vector<1x1x5xi32>
    %217 = arith.cmpi eq, %9, %216 : vector<1x1x5xi32>
    %218 = vector.broadcast %215 : f32 to vector<1x1x5xf32>
    %219 = arith.select %217, %218, %209 : vector<1x1x5xi1>, vector<1x1x5xf32>
    %c0_77 = arith.constant 0 : index
    %c0_78 = arith.constant 0 : index
    %c0_79 = arith.constant 0 : index
    %220 = vector.load %arg5[%c0_77, %c0_78, %c0_79] : memref<1x1x5xf32, #tpu.memory_space<vmem>>, vector<1x1x5xf32>
    tpu.vector_store %arg5[%c0_77, %c0_78, %c0_79], %219 {strides = array<i32>} : memref<1x1x5xf32, #tpu.memory_space<vmem>>, vector<1x1x5xf32>,
    return
  }
  func.func @transform_0(%arg0: i32) -> (i32, i32) {
    %c0_i32 = arith.constant 0 : i32
    %c0_i32_0 = arith.constant 0 : i32
    %c0_i32_1 = arith.constant 0 : i32
    return %c0_i32, %c0_i32_0 : i32, i32
  }
  func.func @transform_1(%arg0: i32) -> (i32, i32, i32) {
    %c0_i32 = arith.constant 0 : i32
    %c0_i32_0 = arith.constant 0 : i32
    %c0_i32_1 = arith.constant 0 : i32
    return %arg0, %c0_i32, %c0_i32_0 : i32, i32, i32
  }
  func.func @transform_2(%arg0: i32) -> (i32, i32, i32) {
    %c0_i32 = arith.constant 0 : i32
    %c0_i32_0 = arith.constant 0 : i32
    %c0_i32_1 = arith.constant 0 : i32
    %c0_i32_2 = arith.constant 0 : i32
    return %c0_i32, %c0_i32_0, %c0_i32_1 : i32, i32, i32
  }
  func.func @transform_3(%arg0: i32) -> (i32, i32, i32, i32) {
    %c0_i32 = arith.constant 0 : i32
    %c0_i32_0 = arith.constant 0 : i32
    %c0_i32_1 = arith.constant 0 : i32
    %c0_i32_2 = arith.constant 0 : i32
    return %c0_i32, %arg0, %c0_i32_0, %c0_i32_1 : i32, i32, i32, i32
  }
  func.func @transform_4(%arg0: i32) -> (i32, i32, i32) {
    %c0_i32 = arith.constant 0 : i32
    %c0_i32_0 = arith.constant 0 : i32
    %c0_i32_1 = arith.constant 0 : i32
    return %arg0, %c0_i32, %c0_i32_0 : i32, i32, i32
  }
}

</mosaic_0001>

<bundles_post_ra>
// kernel: tpu_custom_call.1
= control target key start
LH: loop header
LB: loop body
LE: loop exit
PB: predicated region body
PF: predicated region fallthrough
CT: control target
= control target key end

     0   :  { %10 = vsyncpa [#allocation3], 0  ;;  %s1676_s0 = inlined_call_operand.hbm [shape: f32[32,32], index: 0, kind: input, shape index: {}]   ;;  %s1677_s1 = inlined_call_operand.hbm [shape: f32[2,8,32], index: 1, kind: input, shape index: {}]   ;;  %s1678_s2 = inlined_call_operand.hbm [shape: f32[1,8,32], index: 2, kind: input, shape index: {}]   ;;  %s1679_s3 = inlined_call_operand.hbm [shape: f32[5,2,8,32], index: 3, kind: output, shape index: {0}]   ;;  %s1680_s4 = inlined_call_operand.hbm [shape: f32[2,1,5], index: 4, kind: output, shape index: {1}]  }
   0x1   :  { %11 = vsyncpa [#allocation6], 0 }
   0x2   :  { %13 = vsyncpa [#allocation6 + $0x1], 0 }
   0x3   :  { %14 = vsyncpa [#allocation4], 0 }
   0x4   :  { %16 = vsyncpa [#allocation4 + $0x1], 0 }
   0x5   :  { %17 = vsyncpa [#allocation10], 0 }
   0x6   :  { %19 = vsyncpa [#allocation10 + $0x1], 0  ;;  %s1361_s15 = smov 0   ;;  %s1363_s16 = smov 0  }
   0x7   :  { %s1365_s17 = smov 0   ;;  %s1367_s18 = smov 0  }
   0x8 LB: > { %s1382_s19 = sadd.s32 4294967295, %s1322_s18   ;;  %s941_s20 = sadd.s32 4294967294, %s1322_s18   ;;  %s1322_s18 = sphi %s1367_s18, %s1704_s18   ;;  %s1318_s17 = sphi %s1365_s17, %s1703_s17   ;;  %s1314_s16 = sphi %s1363_s16, %s1702_s16   ;;  %s1310_s15 = sphi %s1361_s15, %s1701_s15  }
   0x9   : > { %p66_p0 = scmp.ne.s32.totalorder %s1314_s16, %s1310_s15  ;;  %p1681_p1 = scmp.eq.s32.totalorder %s1382_s19, 0 }
   0xa   : > { %p117_p3 = scmp.eq.s32.totalorder %s941_s20, 1  ;;  %p942_p5 = scmp.ge.s32.totalorder %s1322_s18, 1 }
   0xb   : > { %p1391_p4 = por %p1681_p1, %p66_p0  ;;  %p150_p7 = scmp.lt.s32.totalorder %s1322_s18, 3 }
   0xc   : > { %p1396_p6 = por %p117_p3, %p66_p0  ;;  %s1324_s24 = smov [#allocation7]  }
   0xd   : > { %s1685_s21 = scalar_select %p1391_p4, 1, 0 }
   0xe   : > { %s1686_s22 = scalar_select %p1396_p6, 1, 0 }
   0xf   : > { %p1401_p8 = pnand %p942_p5, %p150_p7  ;;  %s176_s25 = sshll.u32 %s1324_s24, 4  ;;  %s177_s25 = int_to_ptr.vmem [resolvable:$true] %s176_s25 }
  0x10   : > { %s1325_s26 = smov [#allocation2]   ;;  %s1151_s29 = scalar_lea.vmem %s177_s25, 128 }
  0x11   : > { %s1687_s23 = scalar_select %p1401_p8, 1, 0 }
  0x12   : > { %p1059_p10 = pneg %p1401_p8  ;;  %s162_s27 = sshll.u32 %s1325_s26, 4  ;;  %s163_s27 = int_to_ptr.vmem [resolvable:$true] %s162_s27 }
  0x13   : > { %p1152_p13 = scmp.ne.s32.totalorder %s177_s25, %s1151_s29  ;;  %p1159_p5 = scmp.lt.s32.totalorder %s177_s25, %s177_s25 }
  0x14   : > { %p1410_p11 = pnand %p1059_p10, %p1681_p1  ;;  %p1160_p7 = scmp.lt.s32.totalorder %s1151_s29, %s1151_s29 }
  0x16   : > { %p1142_p12 = pneg %p1410_p11  ;;  %p1161_p9 = por %p1160_p7, %p1159_p5 }
  0x18   : > { %p1154_p0 = pnand %p1152_p13, %p1142_p12 }
  0x1a   : > { %p1155_p3 = pneg %p1154_p0 }
  0x1c   : > { %p1162_p2 = pnand %p1161_p9, %p1155_p3 }
  0x1e   : > { %1165 = shalt.err (!%p1162_p2)
}
  0x1f   : > { %1065 = dma.hbm_to_vmem [thread:$0]  (!%p1410_p11), %s1678_s2, 128, %s177_s25, [#allocation6]  }
  0x20   : > { %s1177_s6 = scalar_lea.vmem %s163_s27, 512  ;;  %p1185_p13 = scmp.lt.s32.totalorder %s163_s27, %s163_s27 }
  0x21   : > { %p1178_p10 = scmp.ne.s32.totalorder %s163_s27, %s1177_s6  ;;  %p1186_p0 = scmp.lt.s32.totalorder %s1177_s6, %s1177_s6 }
  0x23   : > { %p1180_p1 = pnand %p1178_p10, %p1142_p12  ;;  %p1187_p4 = por %p1186_p0, %p1185_p13 }
  0x25   : > { %p1181_p6 = pneg %p1180_p1 }
  0x27   : > { %p1188_p8 = pnand %p1187_p4, %p1181_p6 }
  0x29   : > { %1191 = shalt.err (!%p1188_p8)
}
  0x2a   : > { %s1326_s7 = smov 128   ;;  %s1327_s8 = smov 8  }
  0x2b   : > { %1062 = dma.hbm_to_vmem [thread:$0]  (!%p1410_p11), %s1676_s0, 512, %s163_s27, [#allocation3], %s1326_s7, %s1326_s7, %s1327_s8  }
  0x2c   : > { %s1433_s11 = sadd.s32 1, %s1322_s18   ;;  %s53_s12 = sadd.s32 1, %s1318_s17 }
  0x2d   : > { %s50_s13 = ssub.s32 %s1322_s18, %s1433_s11  ;;  %p60_p1 = scmp.ne.s32.totalorder %s1318_s17, %s1314_s16 }
  0x2e   : > { %p51_p2 = scmp.eq.s32.totalorder %s50_s13, 0  ;;  %p61_p4 = scmp.eq.s32.totalorder %s1322_s18, 0 }
  0x2f   : > { %p1689_p6 = scmp.eq.s32.totalorder %s1382_s19, 1  ;;  %p1079_p9 = scmp.lt.s32.totalorder %s1322_s18, 2 }
  0x30   : > { %s1449_s20 = scalar_select %p51_p2, %s1318_s17, %s53_s12  }
  0x31   : > { %p1443_p8 = por %p1689_p6, %p60_p1  ;;  %p62_p12 = por %p61_p4, %p60_p1 }
  0x32   : > { %s187_s24 = sand.u32 1, %s1322_s18   ;;  %s189_s25 = sand.u32 1, %s1318_s17  }
  0x33   : > { %s1690_s14 = scalar_select %p1443_p8, 1, 0 }
  0x34   : > { %s946_s26 = sshll.u32 %s189_s25, 3  ;;  %s947_s27 = sshll.u32 %s1322_s18, 7 }
  0x35   : > { %s1457_s30 = scalar_lea.hbm %s1677_s1, %s947_s27  ;;  %s191_s5 = scalar_lea.vmem [#allocation5], %s946_s26 }
  0x36   : > { %s198_s6 = sshll.u32 %s191_s5, 4  ;;  %p1459_p11 = pnand %p1079_p9, %p62_p12  ;;  %s199_s6 = int_to_ptr.vmem [resolvable:$true] %s198_s6 }
  0x37   : > { %s188_s8 = scalar_lea.sflag [#allocation6], %s187_s24  ;;  %s1192_s9 = scalar_lea.hbm %s1457_s30, 128 }
  0x38   : > { %p1193_p3 = scmp.ne.s32.totalorder %s1457_s30, %s1192_s9  ;;  %p1194_p5 = pneg %p1459_p11 }
  0x39   : > { %s1197_s13 = scalar_lea.hbm %s1677_s1, 256  ;;  %p1198_p13 = scmp.lt.s32.totalorder %s1457_s30, %s1677_s1 }
  0x3a   : > { %p1195_p7 = pnand %p1194_p5, %p1193_p3  ;;  %p1199_p0 = scmp.lt.s32.totalorder %s1197_s13, %s1192_s9 }
  0x3c   : > { %p1196_p10 = pneg %p1195_p7  ;;  %p1200_p1 = por %p1199_p0, %p1198_p13 }
  0x3e   : > { %p1201_p2 = pnand %p1200_p1, %p1196_p10 }
  0x40   : > { %1204 = shalt.err (!%p1201_p2)
}
  0x41   : > { %s1205_s27 = scalar_lea.vmem %s199_s6, 128  ;;  %s1328_s24 = smov [#allocation5]  }
  0x42   : > { %p1206_p4 = scmp.ne.s32.totalorder %s199_s6, %s1205_s27  ;;  %s1210_s28 = sshll.u32 %s1328_s24, 4  ;;  %s1211_s28 = int_to_ptr.vmem [resolvable:$false] %s1210_s28 }
  0x43   : > { %s1212_s29 = scalar_lea.vmem %s1211_s28, 256  ;;  %p1213_p12 = scmp.lt.s32.totalorder %s199_s6, %s1211_s28 }
  0x44   : > { %p1208_p6 = pnand %p1206_p4, %p1194_p5  ;;  %p1214_p3 = scmp.lt.s32.totalorder %s1212_s29, %s1205_s27 }
  0x46   : > { %p1209_p9 = pneg %p1208_p6  ;;  %p1215_p7 = por %p1214_p3, %p1213_p12 }
  0x48   : > { %p1216_p8 = pnand %p1215_p7, %p1209_p9 }
  0x4a   : > { %1219 = shalt.err (!%p1216_p8)
}
  0x4b   : > { %1069 = dma.hbm_to_vmem [thread:$0]  (!%p1459_p11), %s1457_s30, 128, %s199_s6, %s188_s8  }
  0x4c   : > { %p1692_p10 = scmp.ne.s32.totalorder %s1687_s23, 0 }
  0x4d   : > { %p1693_p13 = scmp.eq.s32.totalorder (!%p1692_p10), %s1382_s19, 0 }
  0x4e   : > { %207 = sbr.rel (%p1692_p10) target bundleno = 1910 (0x776), region = 32 }
  0x53   : > { %1289 = dma.done.wait (%p1693_p13), [#allocation3], 512   ;;  %p1694_p5 = pmov %p1693_p13 }
  0x54   : > { %s213_s5 = sand.u32 1, %s1382_s19   ;;  %s1485_s9 = sand.u32 1, %s1314_s16  }
  0x55   : > { %1291 = vsyncadd (%p1694_p5), [#allocation3], 4294966784  ;;  %s950_s10 = sshll.u32 %s1485_s9, 3  ;;  %s214_s7 = scalar_lea.sflag [#allocation6], %s213_s5 }
  0x56   : > { %s1488_s12 = scalar_lea.vmem [#allocation5], %s950_s10  ;;  %p1695_p8 = scmp.ne.s32.totalorder %s1685_s21, 0 }
  0x58   : > { %1293 = dma.done.wait (%p1695_p8), %s214_s7, 128  }
  0x59   : > { %1295 = vsyncadd (%p1695_p8), %s214_s7, 4294967168  ;;  %p1696_p11 = pmov %p1694_p5 }
  0x5a   : > { %p1697_p0 = pmov %p1694_p5 }
  0x5b   : > { %1297 = dma.done.wait (%p1696_p11), [#allocation6], 128  }
  0x5c   : > { %1299 = vsyncadd (%p1697_p0), [#allocation6], 4294967168  ;;  %v1329_v0 = vmov 0.0   ;;  %vm1330_vm0 = vmmov 0   ;;  %s1028_s21 = smul.u32 40, %s1485_s9  ;;  %v1505_v1 = vld [vmem:[#allocation2 + $0x18] sm:$0xff] }
  0x5d   : > { %984 = vmatprep.subr.mxu0 %v1329_v0  ;;  %992 = vmatprep.mubr.msk.f32.mxu0 %vm1330_vm0, %v1329_v0  ;;  %v1507_v2 = vld [vmem:[#allocation2 + $0x10] sm:$0xff]  ;;  %vm256_vm1 = vcmask 261120   ;;  %v1514_v4 = vld [vmem:[#allocation2 + $0x8] sm:$0xff]  ;;  %v250_v5 = vld [vmem:[#allocation2] sm:$0xff]  ;;  %s960_s6 = sshll.u32 %s1382_s19, 7  ;;  %s790_s26 = scalar_lea.sflag [#allocation4], %s1485_s9 }
  0x5e   : > { %995 = vmatprep.subr.mxu1 %v1329_v0  ;;  %1003 = vmatprep.mubr.msk.f32.mxu1 %vm1330_vm0, %v1329_v0  ;;  %v1510_v3 = vld [vmem:[#allocation7] sm:$0xff]  ;;  %s1516_s23 = scalar_lea.vmem [#allocation8], %s1028_s21  ;;  %v1543_v6 = vld [vmem:[%s1488_s12] sm:$0xff]  ;;  %s1609_s25 = scalar_lea.hbm %s1679_s3, %s960_s6 }
  0x5f   : > { %985 = vmatpush3.msra.mxu0 %v1505_v1  ;;  %996 = vmatpush3.msra.mxu1 %v1505_v1  ;;  %257 = vst.msk [vmem:[%s1516_s23] sm:$0xff] %vm256_vm1, %v1510_v3  ;;  %s806_s30 = sshll.u32 %s1516_s23, 4  ;;  %p1698_p2 = scmp.ne.s32.totalorder %s1690_s14, 0  ;;  %s1603_s30 = int_to_ptr.vmem [resolvable:$true] %s806_s30 }
  0x60   : > { %986 = vmatprep.subr.mxu0 %v1329_v0  ;;  %997 = vmatprep.subr.mxu1 %v1329_v0  ;;  %s1220_s27 = scalar_lea.vmem %s1603_s30, 640  ;;  %s1331_s24 = smov [#allocation8]  }
  0x61   : > { %987 = vmatpush3.msra.mxu0 %v1507_v2  ;;  %998 = vmatpush3.msra.mxu1 %v1507_v2  ;;  %p1221_p1 = scmp.ne.s32.totalorder %s1603_s30, %s1220_s27  ;;  %s1224_s28 = sshll.u32 %s1331_s24, 4  ;;  %s1225_s28 = int_to_ptr.vmem [resolvable:$false] %s1224_s28 }
  0x62   : > { %988 = vmatprep.subr.mxu0 %v1329_v0  ;;  %999 = vmatprep.subr.mxu1 %v1329_v0  ;;  %s1226_s29 = scalar_lea.vmem %s1225_s28, 1280  ;;  %p1227_p9 = scmp.lt.s32.totalorder %s1603_s30, %s1225_s28 }
  0x63   : > { %989 = vmatpush3.msra.mxu0 %v1514_v4  ;;  %1000 = vmatpush3.msra.mxu1 %v1514_v4  ;;  %p1222_p4 = pnand %p1221_p1, %p1698_p2  ;;  %p1228_p12 = scmp.lt.s32.totalorder %s1226_s29, %s1220_s27 }
  0x64   : > { %990 = vmatprep.subr.mxu0 %v1329_v0  ;;  %1001 = vmatprep.subr.mxu1 %v1329_v0 }
  0x65   : > { %991 = vmatpush3.msra.mxu0 %v250_v5  ;;  %1002 = vmatpush3.msra.mxu1 %v250_v5  ;;  %p1223_p6 = pneg %p1222_p4  ;;  %p1229_p3 = por %p1228_p12, %p1227_p9 }
  0x66   : > { %993 = vmatmul.mubr.msk.f32.vlgmr.msra.gmra.mxu0 %vm256_vm1, %v1510_v3  ;;  %1006 = vmatprep.subr.mxu0 %v1329_v0 }
  0x67   : > { %1007 = vmatpush3.msra.mxu0 %v1505_v1  ;;  %1014 = vmatprep.mubr.msk.f32.mxu0 %vm1330_vm0, %v1329_v0  ;;  %p1230_p7 = pnand %p1229_p3, %p1223_p6 }
  0x68   : > { %1008 = vmatprep.subr.mxu0 %v1329_v0  ;;  %1017 = vmatprep.subr.mxu1 %v1329_v0 }
  0x69   : > { %1009 = vmatpush3.msra.mxu0 %v1507_v2 }
  0x6a   : > { %1010 = vmatprep.subr.mxu0 %v1329_v0 }
  0x6b   : > { %1011 = vmatpush3.msra.mxu0 %v1514_v4 }
  0x6c   : > { %1012 = vmatprep.subr.mxu0 %v1329_v0 }
  0x6d   : > { %1013 = vmatpush3.msra.mxu0 %v250_v5 }
 0x126   : > { %v329_v7 = vpop.f32.mrf.mxu0 }
 0x127   : > { %v333_v8 = vsub.f32 %v329_v7, %v1543_v6 }
 0x128   : > { %v994_v9 = vpop.f32.mrf.mxu0 }
 0x129   : > { %v347_v10 = vmul.f32 %v333_v8, %v333_v8  ;;  %v334_v36 = vsub.f32 %v333_v8, %v1543_v6 }
 0x12b   : > { %v348_v11 = vsel %vm256_vm1, %v347_v10, 0.0  ;;  %v335_v40 = vmul.f32 %v334_v36, %v1510_v3 }
 0x12c   : > { %349 = vadd.xlane.f32.xlu0 %v348_v11 }
 0x12d   : > { %v336_v42 = vsel %vm256_vm1, %v335_v40, 0.0 }
 0x1b5   : > { %v350_v12 = vpop.xlane.xlu0 %349 }
 0x1b6   : > { %v351_v13 = vrot.slane %v350_v12, 4 }
 0x1b8   : > { %v352_v14 = vadd.f32 %v351_v13, %v350_v12 }
 0x1ba   : > { %v353_v15 = vrot.slane %v352_v14, 2 }
 0x1bc   : > { %v354_v16 = vadd.f32 %v353_v15, %v352_v14 }
 0x1be   : > { %v355_v17 = vrot.slane %v354_v16, 1 }
 0x1c0   : > { %v356_v18 = vadd.f32 %v355_v17, %v354_v16 }
 0x1c2   : > { %1124 = vrsqrt.f32 %v356_v18  ;;  %vm359_vm2 = vcmp.eq.f32.partialorder %v356_v18, inf  ;;  %v362_v21 = vand.u32 2147483648, %v356_v18  ;;  %vm361_vm3 = vcmp.eq.f32.partialorder %v356_v18, 0.0 }
 0x1cf   : > { %v1125_v19 = vpop.eup %1124 }
 0x1d0   : > { %v358_v20 = vmul.f32 %v1125_v19, %v356_v18 }
 0x1d2   : > { %v360_v22 = vsel %vm359_vm2, %v356_v18, %v358_v20 }
 0x1d3   : > { %v363_v23 = vsel %vm361_vm3, %v362_v21, %v360_v22 }
 0x1d4   : > { %v364_v24 = vadd.f32 1e-06, %v363_v23 }
 0x1d6   : > { %1126 = vrcp.f32 %v364_v24 }
 0x1e3   : > { %v1127_v25 = vpop.eup %1126 }
 0x1e4   : > { %v366_v26 = vmul.f32 %v1127_v25, %v364_v24 }
 0x1e6   : > { %v367_v27 = vsub.f32 2.0, %v366_v26 }
 0x1e8   : > { %v368_v28 = vmul.f32 %v1127_v25, %v367_v27 }
 0x1ea   : > { %v369_v29 = vmax.f32 %v368_v28, 0.0 }
 0x1ec   : > { %v370_v30 = vmin.f32 %v369_v29, 1.0 }
 0x1ee   : > { %v1547_v31 = vmul.f32 %v370_v30, %v333_v8 }
 0x1f0   : > { %v372_v32 = vmul.f32 0.1, %v1547_v31 }
 0x1f2   : > { %v373_v33 = vsub.f32 %v1510_v3, %v372_v32 }
 0x1f4   : > { %953 = vst.msk [vmem:[%s1516_s23 + $0x8] sm:$0xff] %vm256_vm1, %v373_v33  ;;  %1004 = vmatmul.mubr.msk.f32.vlgmr.msra.gmra.mxu1 %vm256_vm1, %v373_v33 }
 0x1f5   : > { %1018 = vmatpush3.msra.mxu1 %v1505_v1  ;;  %1025 = vmatprep.mubr.msk.f32.mxu1 %vm1330_vm0, %v1329_v0 }
 0x1f6   : > { %1019 = vmatprep.subr.mxu1 %v1329_v0 }
 0x1f7   : > { %1020 = vmatpush3.msra.mxu1 %v1507_v2 }
 0x1f8   : > { %1021 = vmatprep.subr.mxu1 %v1329_v0 }
 0x1f9   : > { %1022 = vmatpush3.msra.mxu1 %v1514_v4 }
 0x1fa   : > { %1023 = vmatprep.subr.mxu1 %v1329_v0 }
 0x1fb   : > { %1024 = vmatpush3.msra.mxu1 %v250_v5 }
 0x2b4   : > { %v460_v34 = vpop.f32.mrf.mxu1 }
 0x2b5   : > { %v464_v35 = vsub.f32 %v460_v34, %v1543_v6 }
 0x2b6   : > { %v1005_v37 = vpop.f32.mrf.mxu1 }
 0x2b7   : > { %v478_v38 = vmul.f32 %v464_v35, %v464_v35  ;;  %v465_v41 = vsub.f32 %v464_v35, %v1543_v6 }
 0x2b9   : > { %v479_v39 = vsel %vm256_vm1, %v478_v38, 0.0  ;;  %v466_v43 = vmul.f32 %v465_v41, %v373_v33 }
 0x2ba   : > { %480 = vadd.xlane.f32.xlu0 %v479_v39 }
 0x2bb   : > { %v467_v44 = vsel %vm256_vm1, %v466_v43, 0.0 }
 0x2be   : > { %337 = vadd.xlane.f32.xlu0 %v336_v42 }
 0x2c2   : > { %468 = vadd.xlane.f32.xlu0 %v467_v44 }
 0x343   : > { %v481_v45 = vpop.xlane.xlu0 %480 }
 0x344   : > { %v482_v46 = vrot.slane %v481_v45, 4 }
 0x346   : > { %v483_v47 = vadd.f32 %v482_v46, %v481_v45 }
 0x347   : > { %v338_v48 = vpop.xlane.xlu0 %337 }
 0x348   : > { %v484_v49 = vrot.slane %v483_v47, 2  ;;  %v339_v50 = vrot.slane %v338_v48, 4 }
 0x34a   : > { %v485_v51 = vadd.f32 %v484_v49, %v483_v47  ;;  %v340_v52 = vadd.f32 %v339_v50, %v338_v48  ;;  %v379_v49 = vand.u32 2147483647, %v1547_v31 }
 0x34c   : > { %v486_v53 = vrot.slane %v485_v51, 1  ;;  %v341_v54 = vrot.slane %v340_v52, 2 }
 0x34e   : > { %v487_v55 = vadd.f32 %v486_v53, %v485_v51  ;;  %v342_v56 = vadd.f32 %v341_v54, %v340_v52  ;;  %v380_v51 = vsel %vm256_vm1, %v379_v49, 0.0 }
 0x350   : > { %1128 = vrsqrt.f32 %v487_v55  ;;  %v343_v57 = vrot.slane %v342_v56, 1  ;;  %vm490_vm4 = vcmp.eq.f32.partialorder %v487_v55, inf  ;;  %v493_v61 = vand.u32 2147483648, %v487_v55 }
 0x351   : > { %vm492_vm5 = vcmp.eq.f32.partialorder %v487_v55, 0.0 }
 0x352   : > { %v344_v58 = vadd.f32 %v343_v57, %v342_v56 }
 0x354   : > { %1029 = vpush %v344_v58 }
 0x35d   : > { %v1129_v59 = vpop.eup %1128 }
 0x35e   : > { %v489_v60 = vmul.f32 %v1129_v59, %v487_v55 }
 0x360   : > { %v491_v62 = vsel %vm490_vm4, %v487_v55, %v489_v60  ;;  %v469_v55 = vpop.xlane.xlu0 %468 }
 0x361   : > { %v494_v63 = vsel %vm492_vm5, %v493_v61, %v491_v62  ;;  %v470_v56 = vrot.slane %v469_v55, 4 }
 0x362   : > { %v495_v0 = vadd.f32 1e-06, %v494_v63 }
 0x363   : > { %v471_v58 = vadd.f32 %v470_v56, %v469_v55 }
 0x364   : > { %1130 = vrcp.f32 %v495_v0 }
 0x365   : > { %v472_v63 = vrot.slane %v471_v58, 2 }
 0x371   : > { %v1131_v1 = vpop.eup %1130 }
 0x372   : > { %v497_v2 = vmul.f32 %v1131_v1, %v495_v0 }
 0x374   : > { %v498_v3 = vsub.f32 2.0, %v497_v2 }
 0x376   : > { %v499_v4 = vmul.f32 %v1131_v1, %v498_v3 }
 0x378   : > { %v500_v5 = vmax.f32 %v499_v4, 0.0 }
 0x37a   : > { %v501_v7 = vmin.f32 %v500_v5, 1.0 }
 0x37c   : > { %v502_v8 = vmul.f32 %v501_v7, %v464_v35 }
 0x37e   : > { %v503_v9 = vmul.f32 0.1, %v502_v8  ;;  %v510_v52 = vand.u32 2147483647, %v502_v8 }
 0x380   : > { %v504_v10 = vsub.f32 %v373_v33, %v503_v9  ;;  %v511_v53 = vsel %vm256_vm1, %v510_v52, 0.0 }
 0x382   : > { %955 = vst.msk [vmem:[%s1516_s23 + $0x10] sm:$0xff] %vm256_vm1, %v504_v10  ;;  %1015 = vmatmul.mubr.msk.f32.vlgmr.msra.gmra.mxu0 %vm256_vm1, %v504_v10 }
 0x442   : > { %v591_v11 = vpop.f32.mrf.mxu0 }
 0x443   : > { %v595_v12 = vsub.f32 %v591_v11, %v1543_v6  ;;  %v473_v11 = vadd.f32 %v472_v63, %v471_v58 }
 0x444   : > { %v1016_v13 = vpop.f32.mrf.mxu0 }
 0x445   : > { %v609_v14 = vmul.f32 %v595_v12, %v595_v12  ;;  %v596_v15 = vsub.f32 %v595_v12, %v1543_v6 }
 0x447   : > { %v610_v16 = vsel %vm256_vm1, %v609_v14, 0.0  ;;  %v597_v17 = vmul.f32 %v596_v15, %v504_v10 }
 0x448   : > { %611 = vadd.xlane.f32.xlu1 %v610_v16 }
 0x449   : > { %v598_v18 = vsel %vm256_vm1, %v597_v17, 0.0 }
 0x44a   : > { %599 = vadd.xlane.f32.xlu0 %v598_v18 }
 0x4d1   : > { %v612_v19 = vpop.xlane.xlu1 %611 }
 0x4d2   : > { %v613_v20 = vrot.slane %v612_v19, 4 }
 0x4d3   : > { %v600_v57 = vpop.xlane.xlu0 %599 }
 0x4d4   : > { %v614_v21 = vadd.f32 %v613_v20, %v612_v19  ;;  %v601_v31 = vrot.slane %v600_v57, 4  ;;  %v474_v20 = vrot.slane %v473_v11, 1 }
 0x4d6   : > { %v615_v22 = vrot.slane %v614_v21, 2  ;;  %v602_v0 = vadd.f32 %v601_v31, %v600_v57 }
 0x4d8   : > { %v616_v23 = vadd.f32 %v615_v22, %v614_v21  ;;  %v603_v8 = vrot.slane %v602_v0, 2 }
 0x4da   : > { %v617_v24 = vrot.slane %v616_v23, 1  ;;  %v604_v21 = vadd.f32 %v603_v8, %v602_v0 }
 0x4dc   : > { %v618_v25 = vadd.f32 %v617_v24, %v616_v23 }
 0x4de   : > { %1132 = vrsqrt.f32 %v618_v25  ;;  %vm621_vm6 = vcmp.eq.f32.partialorder %v618_v25, inf  ;;  %v624_v28 = vand.u32 2147483648, %v618_v25  ;;  %vm623_vm7 = vcmp.eq.f32.partialorder %v618_v25, 0.0 }
 0x4eb   : > { %v1133_v26 = vpop.eup %1132 }
 0x4ec   : > { %v620_v27 = vmul.f32 %v1133_v26, %v618_v25 }
 0x4ee   : > { %v622_v29 = vsel %vm621_vm6, %v618_v25, %v620_v27 }
 0x4ef   : > { %v625_v30 = vsel %vm623_vm7, %v624_v28, %v622_v29  ;;  %v475_v29 = vadd.f32 %v474_v20, %v473_v11 }
 0x4f0   : > { %v626_v32 = vadd.f32 1e-06, %v625_v30  ;;  %v605_v30 = vrot.slane %v604_v21, 1 }
 0x4f2   : > { %1134 = vrcp.f32 %v626_v32 }
 0x4ff   : > { %v1135_v33 = vpop.eup %1134 }
 0x500   : > { %v628_v34 = vmul.f32 %v1135_v33, %v626_v32 }
 0x502   : > { %v629_v35 = vsub.f32 2.0, %v628_v34 }
 0x504   : > { %v630_v36 = vmul.f32 %v1135_v33, %v629_v35 }
 0x506   : > { %v631_v37 = vmax.f32 %v630_v36, 0.0  ;;  %v606_v36 = vadd.f32 %v605_v30, %v604_v21 }
 0x508   : > { %v632_v38 = vmin.f32 %v631_v37, 1.0 }
 0x50a   : > { %v633_v39 = vmul.f32 %v632_v38, %v595_v12 }
 0x50c   : > { %v634_v40 = vmul.f32 0.1, %v633_v39  ;;  %v641_v54 = vand.u32 2147483647, %v633_v39 }
 0x50e   : > { %v1576_v41 = vsub.f32 %v504_v10, %v634_v40 }
 0x510   : > { %957 = vst.msk [vmem:[%s1516_s23 + $0x18] sm:$0xff] %vm256_vm1, %v1576_v41  ;;  %1026 = vmatmul.mubr.msk.f32.vlgmr.msra.gmra.mxu1 %vm256_vm1, %v1576_v41 }
 0x5d0   : > { %v722_v42 = vpop.f32.mrf.mxu1 }
 0x5d1   : > { %v1584_v43 = vsub.f32 %v722_v42, %v1543_v6 }
 0x5d2   : > { %v1027_v44 = vpop.f32.mrf.mxu1 }
 0x5d3   : > { %v740_v45 = vmul.f32 %v1584_v43, %v1584_v43  ;;  %v727_v46 = vsub.f32 %v1584_v43, %v1543_v6  ;;  %v642_v6 = vsel %vm256_vm1, %v641_v54, 0.0 }
 0x5d5   : > { %v741_v47 = vsel %vm256_vm1, %v740_v45, 0.0  ;;  %v728_v48 = vmul.f32 %v727_v46, %v1576_v41 }
 0x5d6   : > { %742 = vadd.xlane.f32.xlu1 %v741_v47 }
 0x5d7   : > { %v729_v50 = vsel %vm256_vm1, %v728_v48, 0.0 }
 0x5d8   : > { %730 = vadd.xlane.f32.xlu0 %v729_v50 }
 0x5da   : > { %381 = vadd.xlane.f32.xlu1 %v380_v51 }
 0x5de   : > { %512 = vadd.xlane.f32.xlu1 %v511_v53 }
 0x5e2   : > { %643 = vadd.xlane.f32.xlu1 %v642_v6 }
 0x65f   : > { %v743_v59 = vpop.xlane.xlu1 %742 }
 0x660   : > { %v744_v60 = vrot.slane %v743_v59, 4 }
 0x661   : > { %v731_v61 = vpop.xlane.xlu0 %730 }
 0x662   : > { %v745_v62 = vadd.f32 %v744_v60, %v743_v59  ;;  %v732_v1 = vrot.slane %v731_v61, 4 }
 0x663   : > { %v382_v2 = vpop.xlane.xlu1 %381 }
 0x664   : > { %v746_v3 = vrot.slane %v745_v62, 2  ;;  %v383_v4 = vrot.slane %v382_v2, 4  ;;  %v733_v9 = vadd.f32 %v732_v1, %v731_v61 }
 0x666   : > { %v747_v5 = vadd.f32 %v746_v3, %v745_v62  ;;  %v384_v7 = vadd.f32 %v383_v4, %v382_v2  ;;  %v734_v18 = vrot.slane %v733_v9, 2 }
 0x667   : > { %v513_v10 = vpop.xlane.xlu1 %512 }
 0x668   : > { %v748_v12 = vrot.slane %v747_v5, 1  ;;  %v385_v13 = vrot.slane %v384_v7, 2  ;;  %v514_v14 = vrot.slane %v513_v10, 4  ;;  %v735_v28 = vadd.f32 %v734_v18, %v733_v9 }
 0x66a   : > { %v749_v15 = vadd.f32 %v748_v12, %v747_v5  ;;  %v515_v16 = vadd.f32 %v514_v14, %v513_v10  ;;  %v386_v17 = vadd.f32 %v385_v13, %v384_v7  ;;  %v736_v37 = vrot.slane %v735_v28, 1 }
 0x66b   : > { %v644_v19 = vpop.xlane.xlu1 %643 }
 0x66c   : > { %1136 = vrsqrt.f32 %v749_v15  ;;  %v516_v22 = vrot.slane %v515_v16, 2  ;;  %v645_v23 = vrot.slane %v644_v19, 4  ;;  %v387_v24 = vrot.slane %v386_v17, 1 }
 0x66d   : > { %v737_v40 = vadd.f32 %v736_v37, %v735_v28  ;;  %vm752_vm8 = vcmp.eq.f32.partialorder %v749_v15, inf  ;;  %v755_v45 = vand.u32 2147483648, %v749_v15  ;;  %vm754_vm9 = vcmp.eq.f32.partialorder %v749_v15, 0.0 }
 0x66e   : > { %v646_v25 = vadd.f32 %v645_v23, %v644_v19  ;;  %v388_v26 = vadd.f32 %v387_v24, %v386_v17  ;;  %v517_v27 = vadd.f32 %v516_v22, %v515_v16 }
 0x670   : > { %v647_v32 = vrot.slane %v646_v25, 2  ;;  %1031 = vpush %v388_v26  ;;  %v518_v33 = vrot.slane %v517_v27, 1 }
 0x671   : > { %1033 = vpush %v475_v29 }
 0x672   : > { %v519_v34 = vadd.f32 %v518_v33, %v517_v27  ;;  %v648_v35 = vadd.f32 %v647_v32, %v646_v25 }
 0x674   : > { %1035 = vpush %v519_v34  ;;  %v649_v38 = vrot.slane %v648_v35, 1 }
 0x675   : > { %1037 = vpush %v606_v36 }
 0x676   : > { %v650_v39 = vadd.f32 %v649_v38, %v648_v35 }
 0x678   : > { %1039 = vpush %v650_v39 }
 0x679   : > { %v1137_v42 = vpop.eup %1136  ;;  %1041 = vpush %v737_v40 }
 0x67a   : > { %v751_v44 = vmul.f32 %v1137_v42, %v749_v15 }
 0x67c   : > { %v753_v46 = vsel %vm752_vm8, %v749_v15, %v751_v44 }
 0x67d   : > { %v756_v47 = vsel %vm754_vm9, %v755_v45, %v753_v46 }
 0x67e   : > { %v757_v48 = vadd.f32 1e-06, %v756_v47 }
 0x680   : > { %1138 = vrcp.f32 %v757_v48 }
 0x68d   : > { %v1139_v49 = vpop.eup %1138 }
 0x68e   : > { %v759_v50 = vmul.f32 %v1139_v49, %v757_v48 }
 0x690   : > { %v760_v51 = vsub.f32 2.0, %v759_v50 }
 0x692   : > { %v761_v52 = vmul.f32 %v1139_v49, %v760_v51 }
 0x694   : > { %v762_v53 = vmax.f32 %v761_v52, 0.0 }
 0x696   : > { %v763_v54 = vmin.f32 %v762_v53, 1.0 }
 0x698   : > { %v764_v6 = vmul.f32 %v763_v54, %v1584_v43 }
 0x69a   : > { %v772_v55 = vand.u32 2147483647, %v764_v6  ;;  %v765_v56 = vmul.f32 0.1, %v764_v6 }
 0x69c   : > { %v773_v57 = vsel %vm256_vm1, %v772_v55, 0.0  ;;  %v766_v58 = vsub.f32 %v1576_v41, %v765_v56 }
 0x69d   : > { %774 = vadd.xlane.f32.xlu1 %v773_v57 }
 0x69e   : > { %959 = vst.msk [vmem:[%s1516_s23 + $0x20] sm:$0xff] %vm256_vm1, %v766_v58 }
 0x69f   : > { %1233 = shalt.err (!%p1230_p7)
}
 0x6a0   : > { %s1234_s5 = scalar_lea.hbm %s1609_s25, 640  ;;  %s1238_s12 = scalar_lea.hbm %s1679_s3, 1280 }
 0x6a1   : > { %p1235_p10 = scmp.ne.s32.totalorder %s1609_s25, %s1234_s5  ;;  %p1239_p8 = scmp.lt.s32.totalorder %s1609_s25, %s1679_s3 }
 0x6a2   : > { %p1240_p11 = scmp.lt.s32.totalorder %s1238_s12, %s1234_s5 }
 0x6a3   : > { %p1236_p13 = pnand %p1235_p10, %p1698_p2 }
 0x6a4   : > { %p1241_p0 = por %p1240_p11, %p1239_p8 }
 0x6a5   : > { %p1237_p5 = pneg %p1236_p13 }
 0x6a7   : > { %p1242_p1 = pnand %p1241_p0, %p1237_p5 }
 0x6a9   : > { %1245 = shalt.err (!%p1242_p1)
}
 0x6aa   : > { %s1332_s6 = smov 128   ;;  %s1333_s8 = smov 256   ;;  %v258_v63 = vlaneseq  ;;  %vm787_vm15 = vcmask 32768  }
 0x6ab   : > { %s1334_s13 = smov 8   ;;  %s1030_s27 = spop %1029 }
 0x6ac   : > { %1055 = dma.vmem_to_hbm [thread:$0]  (%p1698_p2), %s1603_s30, 640, %s1609_s25, %s790_s26, %s1332_s6, %s1333_s8, %s1334_s13   ;;  %v259_v0 = vand.u32 127, %v258_v63 }
 0x6ad   : > { %s1032_s24 = spop %1031  ;;  %s346_s7 = smul.f32 0.5, %s1030_s27 }
 0x6ae   : > { %s1034_s28 = spop %1033  ;;  %vm376_vm10 = vcmp.eq.s32.totalorder %v259_v0, 0  ;;  %vm507_vm11 = vcmp.eq.s32.totalorder %v259_v0, 1  ;;  %vm638_vm12 = vcmp.eq.s32.totalorder %v259_v0, 2  ;;  %s961_s6 = sshll.u32 %s1382_s19, 4  ;;  %vm769_vm13 = vcmp.eq.s32.totalorder %v259_v0, 3 }
 0x6af   : > { %s1036_s29 = spop %1035  ;;  %s477_s30 = smul.f32 0.5, %s1034_s28  ;;  %v377_v1 = vstv %s346_s7  ;;  %vm784_vm14 = vcmp.eq.s32.totalorder %v259_v0, 4 }
 0x6b0   : > { %s1038_s5 = spop %1037  ;;  %s521_s21 = sadd.f32 %s1036_s29, %s1032_s24  ;;  %v378_v4 = vsel %vm376_vm10, %v377_v1, 0.0 }
 0x6b1   : > { %s1040_s10 = spop %1039  ;;  %s608_s25 = smul.f32 0.5, %s1038_s5  ;;  %v508_v2 = vstv %s477_s30 }
 0x6b2   : > { %s1042_s12 = spop %1041  ;;  %s652_s23 = sadd.f32 %s1040_s10, %s521_s21  ;;  %v509_v7 = vsel %vm507_vm11, %v508_v2, %v378_v4 }
 0x6b3   : > { %s739_s26 = smul.f32 0.5, %s1042_s12  ;;  %v639_v3 = vstv %s608_s25  ;;  %s249_s13 = scalar_lea.vmem [#allocation9], %s1485_s9 }
 0x6b4   : > { %s822_s27 = sshll.u32 %s249_s13, 4  ;;  %v640_v8 = vsel %vm638_vm12, %v639_v3, %v509_v7  ;;  %s1639_s5 = scalar_lea.hbm %s1680_s4, %s961_s6  ;;  %s823_s27 = int_to_ptr.vmem [resolvable:$true] %s822_s27 }
 0x6b5   : > { %v770_v5 = vstv %s739_s26  ;;  %s795_s19 = scalar_lea.sflag [#allocation10], %s1485_s9  ;;  %s1246_s10 = scalar_lea.vmem %s823_s27, 16 }
 0x6b6   : > { %v771_v9 = vsel %vm769_vm13, %v770_v5, %v640_v8  ;;  %p1247_p4 = scmp.ne.s32.totalorder %s823_s27, %s1246_s10  ;;  %s1335_s7 = smov [#allocation9]  }
 0x6b7   : > { %s1250_s12 = sshll.u32 %s1335_s7, 4  ;;  %s1251_s12 = int_to_ptr.vmem [resolvable:$false] %s1250_s12 }
 0x6b8   : > { %p1248_p6 = pnand %p1247_p4, %p1698_p2  ;;  %s1252_s30 = scalar_lea.vmem %s1251_s12, 32 }
 0x6b9   : > { %p1253_p12 = scmp.lt.s32.totalorder %s823_s27, %s1251_s12  ;;  %p1254_p3 = scmp.lt.s32.totalorder %s1252_s30, %s1246_s10 }
 0x6ba   : > { %p1249_p9 = pneg %p1248_p6 }
 0x6bb   : > { %p1255_p7 = por %p1254_p3, %p1253_p12 }
 0x6bd   : > { %p1256_p10 = pnand %p1255_p7, %p1249_p9 }
 0x726   : > { %v775_v41 = vpop.xlane.xlu1 %774 }
 0x727   : > { %v776_v43 = vrot.slane %v775_v41, 4 }
 0x729   : > { %v777_v31 = vadd.f32 %v776_v43, %v775_v41 }
 0x72b   : > { %v778_v59 = vrot.slane %v777_v31, 2 }
 0x72d   : > { %v779_v60 = vadd.f32 %v778_v59, %v777_v31 }
 0x72f   : > { %v780_v61 = vrot.slane %v779_v60, 1 }
 0x731   : > { %v781_v62 = vadd.f32 %v780_v61, %v779_v60 }
 0x733   : > { %1043 = vpush %v781_v62 }
 0x764   : > { %s1044_s8 = spop %1043 }
 0x765   : > { %s783_s28 = sadd.f32 %s1044_s8, %s652_s23 }
 0x767   : > { %v785_v10 = vstv %s783_s28 }
 0x768   : > { %v786_v11 = vsel %vm784_vm14, %v785_v10, %v771_v9 }
 0x769   : > { %788 = vst.msk [vmem:[%s249_s13] sm:$0x1] %vm787_vm15, %v786_v11 }
 0x76a   : > { %1259 = shalt.err (!%p1256_p10)
}
 0x76b   : > { %s1260_s25 = scalar_lea.hbm %s1639_s5, 16  ;;  %s1264_s21 = scalar_lea.hbm %s1680_s4, 32 }
 0x76c   : > { %p1261_p13 = scmp.ne.s32.totalorder %s1639_s5, %s1260_s25  ;;  %p1265_p11 = scmp.lt.s32.totalorder %s1639_s5, %s1680_s4 }
 0x76d   : > { %p1266_p0 = scmp.lt.s32.totalorder %s1264_s21, %s1260_s25 }
 0x76e   : > { %p1262_p5 = pnand %p1261_p13, %p1698_p2 }
 0x76f   : > { %p1267_p1 = por %p1266_p0, %p1265_p11 }
 0x770   : > { %p1263_p8 = pneg %p1262_p5 }
 0x772   : > { %p1268_p4 = pnand %p1267_p1, %p1263_p8 }
 0x774   : > { %1271 = shalt.err (!%p1268_p4)
}
 0x775   : > { %1056 = dma.vmem_to_hbm [thread:$0]  (%p1698_p2), %s823_s27, 16, %s1639_s5, %s795_s19  }
 0x776 PF: > { %s834_s8 = sand.u32 1, %s1310_s15   ;;  %p1699_p6 = scmp.ne.s32.totalorder %s1686_s22, 0 }
 0x777   : > { %p1700_p9 = scmp.ge.s32.totalorder %s1322_s18, 2  ;;  %s835_s13 = scalar_lea.sflag [#allocation4], %s834_s8 }
 0x779   : > { %p1071_p12 = pnand %p1700_p9, %p1699_p6 }
 0x77b   : > { %p1072_p3 = pneg %p1071_p12 }
 0x77d   : > { %1301 = dma.done.wait (%p1072_p3), %s835_s13, 640  }
 0x77e   : > { %1303 = vsyncadd (%p1072_p3), %s835_s13, 4294966656  ;;  %s844_s28 = scalar_lea.sflag [#allocation10], %s834_s8 }
 0x77f   : > { %1305 = dma.done.wait (%p1072_p3), %s844_s28, 16  }
 0x780   : > { %1307 = vsyncadd (%p1072_p3), %s844_s28, 4294967280  ;;  %p22_p2 = scmp.ge.s32.totalorder %s1433_s11, 4   ;;  %s1701_s15 = smov %s1314_s16 }
 0x781   : > { %s1702_s16 = smov %s1318_s17  ;;  %s1703_s17 = smov %s1449_s20 }
 0x782   : > { %s1704_s18 = smov %s1433_s11  ;;  %24 = sbr.rel (!%p22_p2) target bundleno = 8 (0x8), region = 107 }
 0x787   :  { %848 = vsyncpa [#allocation3], 1 }
 0x788   :  { %850 = vsyncpa [#allocation3 + $0x1], 1 }
 0x789   :  { %851 = vsyncpa [#allocation6], 1 }
 0x78a   :  { %853 = vsyncpa [#allocation6 + $0x1], 1 }
 0x78b   :  { %854 = vsyncpa [#allocation4], 1 }
 0x78c   :  { %856 = vsyncpa [#allocation4 + $0x1], 1 }
 0x78d   :  { %857 = vsyncpa [#allocation10], 1 }
 0x78e   :  { %859 = vsyncpa [#allocation10 + $0x1], 1 }

</bundles_post_ra>
